<compile_context>
chip_gen: v7x
topology: tpu7x:2x2x1
jax: 0.10.0
libtpu: 0.0.40
codegen_flags: <defaults>
</compile_context>

<pallas_src>
import math

import jax
import jax.numpy as jnp
from jax.experimental import pallas as pl
from jax.experimental.pallas import tpu as pltpu


def _rbfnet_kernel(x_ref, cs2_ref, sqn_ref, bcs_ref, w_ref, b_ref, o_ref):
    x = x_ref[...]                                   # (TB, K) x.dtype
    xf = x.astype(jnp.float32)

    # e = -beta * ||x - c||^2 via the norm expansion; both terms on the MXU.
    e = (jnp.dot(x, cs2_ref[...], preferred_element_type=jnp.float32)      # 2*beta*x.c
         + jnp.dot(xf * xf, sqn_ref[...], preferred_element_type=jnp.float32)  # -beta*||x||^2
         + bcs_ref[...])                                                    # -beta*||c||^2

    rbf = jnp.exp(jnp.minimum(e, 0.0))               # EUP; clamp guards cancellation

    out = jnp.dot(rbf, w_ref[...], preferred_element_type=jnp.float32) + b_ref[...]
    o_ref[...] = out.astype(o_ref.dtype)             # (TB, Og)


def _round_up(n, m):
    return ((n + m - 1) // m) * m


def _block_diag(base, g):
    """(r, c) -> (g*r, g*c) block-diagonal with g copies of `base` on the diagonal."""
    r, c = base.shape
    eye = jnp.eye(g, dtype=base.dtype)
    return jnp.einsum("gh,rc->grhc", eye, base).reshape(g * r, g * c)


def rbfnet_forward(x, centers, log_beta, fc_w, fc_b, *, tb=4096):
    """RBFNet_cl forward. x: (B, in_features) -> (B, output_size) float32.

    tb: batch-row tile size per grid step, in (packed) rows; rounded to a
        multiple of 8.
    """
    B, D = x.shape
    J = centers.shape[0]
    O = fc_w.shape[0]
    x_dtype = x.dtype

    # ---- Grid-invariant preprocessing (tiny, hoisted out of the kernel) ------
    beta = jax.nn.softplus(log_beta.astype(jnp.float32))                 # (J,)
    c32 = centers.astype(jnp.float32)
    cs2_base = 2.0 * (beta[None, :] * c32.T)                             # (D, J)
    sqn_base = jnp.broadcast_to(-beta[None, :], (D, J)).astype(jnp.float32)
    bcs_base = -(beta * jnp.sum(c32 * c32, axis=-1))                     # (J,)
    w_base = fc_w.astype(jnp.float32).T                                  # (J, O)
    b_base = fc_b.astype(jnp.float32)                                    # (O,)

    # ---- Lane packing: fold G batch rows into the 128-lane axis --------------
    G = 128 // D if (0 < D <= 128 and 128 % D == 0) else 1
    if G > 1 and B % G != 0:
        # Rare ragged-batch pad so the packed reshape is a free row-major bitcast.
        x = jnp.pad(x, ((0, _round_up(B, G) - B), (0, 0)))
    Bp = x.shape[0]
    R = Bp // G                                                          # packed rows

    if G > 1:
        xr = x.reshape(R, G * D)                   # free (row-major) relayout
        cs2 = _block_diag(cs2_base, G)
        sqn = _block_diag(sqn_base, G)
        w = _block_diag(w_base, G)
        bcs = jnp.tile(bcs_base, G).reshape(1, G * J)
        brow = jnp.tile(b_base, G).reshape(1, G * O)
    else:
        xr = x
        cs2, sqn, w = cs2_base, sqn_base, w_base
        bcs = bcs_base.reshape(1, J)
        brow = b_base.reshape(1, O)

    cs2 = cs2.astype(x_dtype)            # cross-term matmul runs in x's dtype
    K = xr.shape[1]                      # G*D
    Jg = G * J
    Og = G * O

    # ---- Batch tiling (non-divisible tails handled by the grid, no pad copy) -
    tb = max(8, _round_up(tb, 8))
    if R <= tb:
        tb_eff, grid = R, (1,)
    else:
        tb_eff, grid = tb, (pl.cdiv(R, tb),)

    # ---- VMEM budget (lane dims pad to 128 in VMEM) ---------------------------
    lane_x = _round_up(K, 128)
    lane_o = _round_up(Og, 128)
    vmem_needed = 2 * tb_eff * (lane_x * jnp.dtype(x_dtype).itemsize + lane_o * 4)
    vmem_needed += 4 << 20                                  # resident params + slack
    vmem_limit = int(min(max(vmem_needed, 16 << 20), 32 << 20))   # safe on v5e/v6e/v7x

    # ---- Advisory cost estimate (lets XLA schedule around the call) ----------
    flops = 2 * R * (2 * K * Jg + Jg * Og) + 4 * R * Jg
    transcendentals = R * Jg
    bytes_accessed = (R * K * jnp.dtype(x_dtype).itemsize            # x read
                      + R * Og * 4                                   # out write
                      + 2 * K * Jg * 4 + Jg * 4 + Jg * Og * 4 + Og * 4)
    cost = pl.CostEstimate(flops=int(flops),
                           transcendentals=int(transcendentals),
                           bytes_accessed=int(bytes_accessed))

    const = lambda i: (0, 0)
    out = pl.pallas_call(
        _rbfnet_kernel,
        out_shape=jax.ShapeDtypeStruct((R, Og), jnp.float32),
        grid=grid,
        in_specs=[
            pl.BlockSpec((tb_eff, K), lambda i: (i, 0)),   # x tile, pipelined
            pl.BlockSpec((K, Jg), const),                  # 2*beta*c   (block-diag if packed)
            pl.BlockSpec((K, Jg), const),                  # -beta      (block-diag if packed)
            pl.BlockSpec((1, Jg), const),                  # -beta*||c||^2
            pl.BlockSpec((Jg, Og), const),                 # fc weight^T (block-diag if packed)
            pl.BlockSpec((1, Og), const),                  # fc bias
        ],
        out_specs=pl.BlockSpec((tb_eff, Og), lambda i: (i, 0)),
        compiler_params=pltpu.CompilerParams(
            dimension_semantics=("parallel",),             # megacore on v7x
            vmem_limit_bytes=vmem_limit,
        ),
        cost_estimate=cost,
    )(xr, cs2, sqn, bcs, w, brow)

    return out.reshape(Bp, O)[:B]


def _reference_forward(x, centers, log_beta, fc_w, fc_b):
    beta = jax.nn.softplus(log_beta)
    diff = x[:, None, :] - centers[None, :, :]
    dist = jnp.sum(diff * diff, axis=-1)
    rbf = jnp.exp(-beta[None, :] * dist)
    return rbf @ fc_w.T + fc_b[None, :]


if __name__ == "__main__":
    # Shapes consistent with the module: input_size=16, rbf_units=32, output_size=8.
    B, D, J, O = 8, 16, 32, 8

    key = jax.random.PRNGKey(0)
    k_x, k_c, k_w, k_x2, k_c3, k_w3, k_x3 = jax.random.split(key, 7)

    x = jax.random.normal(k_x, (B, D), dtype=jnp.float32)

    # Deterministic params matching the PyTorch __init__: centers ~ U(-1, 1),
    # log_beta = log(0.1), fc weight xavier-uniform, bias zeros.
    centers = jax.random.uniform(k_c, (J, D), minval=-1.0, maxval=1.0,
                                 dtype=jnp.float32)
    log_beta = jnp.full((J,), math.log(0.1), dtype=jnp.float32)
    xavier_bound = math.sqrt(6.0 / (J + O))
    fc_w = jax.random.uniform(k_w, (O, J), minval=-xavier_bound,
                              maxval=xavier_bound, dtype=jnp.float32)
    fc_b = jnp.zeros((O,), dtype=jnp.float32)

    # 1) Small batch, f32, lane-packed path (G = 128 // 16 = 8), tight tolerance.
    out = jax.block_until_ready(rbfnet_forward(x, centers, log_beta, fc_w, fc_b))
    ref = _reference_forward(x, centers, log_beta, fc_w, fc_b)
    assert out.shape == (B, O)
    assert jnp.allclose(out, ref, atol=1e-4, rtol=1e-4), (
        f"max abs err {jnp.max(jnp.abs(out - ref))}")

    # 2) Larger batch, bf16 inputs (x already bf16), multi-step grid with a
    #    non-divisible tail block (no wrapper pad/copy of x).
    B2 = 200
    x2 = jax.random.normal(k_x2, (B2, D), dtype=jnp.float32)
    out2 = jax.block_until_ready(
        rbfnet_forward(x2.astype(jnp.bfloat16), centers, log_beta, fc_w, fc_b, tb=8))
    ref2 = _reference_forward(x2, centers, log_beta, fc_w, fc_b)
    assert out2.shape == (B2, O)
    assert jnp.allclose(out2, ref2, atol=5e-2, rtol=5e-2), (
        f"max abs err {jnp.max(jnp.abs(out2 - ref2))}")

    # 3) Feature dim that does not divide 128 -> unpacked fallback path,
    #    ragged batch + non-divisible grid.
    B3, D3, J3, O3 = 37, 10, 24, 5
    x3 = jax.random.normal(k_x3, (B3, D3), dtype=jnp.float32)
    centers3 = jax.random.uniform(k_c3, (J3, D3), minval=-1.0, maxval=1.0,
                                  dtype=jnp.float32)
    log_beta3 = jnp.full((J3,), math.log(0.1), dtype=jnp.float32)
    xb3 = math.sqrt(6.0 / (J3 + O3))
    fc_w3 = jax.random.uniform(k_w3, (O3, J3), minval=-xb3, maxval=xb3,
                               dtype=jnp.float32)
    fc_b3 = jnp.zeros((O3,), dtype=jnp.float32)
    out3 = jax.block_until_ready(
        rbfnet_forward(x3, centers3, log_beta3, fc_w3, fc_b3, tb=16))
    ref3 = _reference_forward(x3, centers3, log_beta3, fc_w3, fc_b3)
    assert out3.shape == (B3, O3)
    assert jnp.allclose(out3, ref3, atol=1e-4, rtol=1e-4), (
        f"max abs err {jnp.max(jnp.abs(out3 - ref3))}")

    print("KERNEL_OK")
</pallas_src>

<mosaic_0001>
module attributes {stable_mosaic.version = 11 : i64} {
  func.func @_rbfnet_kernel(%arg0: i32, %arg1: memref<1x128xf32, #tpu.memory_space<vmem>>, %arg2: memref<128x256xf32, #tpu.memory_space<vmem>>, %arg3: memref<128x256xf32, #tpu.memory_space<vmem>>, %arg4: memref<1x256xf32, #tpu.memory_space<vmem>>, %arg5: memref<256x64xf32, #tpu.memory_space<vmem>>, %arg6: memref<1x64xf32, #tpu.memory_space<vmem>>, %arg7: memref<1x64xf32, #tpu.memory_space<vmem>>) attributes {dimension_semantics = [#tpu.dimension_semantics<parallel>], iteration_bounds = array<i64: 1>, scalar_prefetch = 0 : i64, scratch_operands = 0 : i64, tpu.core_type = #tpu.core_type<tc>, window_params = [{transform_indices = @transform_0, window_bounds = array<i64: 1, 128>}, {pipeline_mode = #tpu.pipeline_mode<synchronous>, transform_indices = @transform_1, window_bounds = array<i64: 128, 256>}, {pipeline_mode = #tpu.pipeline_mode<synchronous>, transform_indices = @transform_2, window_bounds = array<i64: 128, 256>}, {pipeline_mode = #tpu.pipeline_mode<synchronous>, transform_indices = @transform_3, window_bounds = array<i64: 1, 256>}, {pipeline_mode = #tpu.pipeline_mode<synchronous>, transform_indices = @transform_4, window_bounds = array<i64: 256, 64>}, {pipeline_mode = #tpu.pipeline_mode<synchronous>, transform_indices = @transform_5, window_bounds = array<i64: 1, 64>}, {transform_indices = @transform_6, window_bounds = array<i64: 1, 64>}]} {
    %c0 = arith.constant 0 : index
    %c0_0 = arith.constant 0 : index
    %0 = vector.load %arg1[%c0, %c0_0] : memref<1x128xf32, #tpu.memory_space<vmem>>, vector<1x128xf32>
    %c0_1 = arith.constant 0 : index
    %c0_2 = arith.constant 0 : index
    %1 = vector.load %arg2[%c0_1, %c0_2] : memref<128x256xf32, #tpu.memory_space<vmem>>, vector<128x256xf32>
    %cst = arith.constant dense<0.000000e+00> : vector<1x256xf32>
    %2 = tpu.matmul %0, %1, %cst {dimension_numbers = #tpu.dot_dimension_numbers<[1], [0], [0], [1], [0, 0, 1, 1], [], []>} : vector<1x128xf32>, vector<128x256xf32>, vector<1x256xf32> -> vector<1x256xf32>
    %3 = arith.mulf %0, %0 : vector<1x128xf32>
    %c0_3 = arith.constant 0 : index
    %c0_4 = arith.constant 0 : index
    %4 = vector.load %arg3[%c0_3, %c0_4] : memref<128x256xf32, #tpu.memory_space<vmem>>, vector<128x256xf32>
    %cst_5 = arith.constant dense<0.000000e+00> : vector<1x256xf32>
    %5 = tpu.matmul %3, %4, %cst_5 {dimension_numbers = #tpu.dot_dimension_numbers<[1], [0], [0], [1], [0, 0, 1, 1], [], []>} : vector<1x128xf32>, vector<128x256xf32>, vector<1x256xf32> -> vector<1x256xf32>
    %6 = arith.addf %2, %5 : vector<1x256xf32>
    %c0_6 = arith.constant 0 : index
    %c0_7 = arith.constant 0 : index
    %7 = vector.load %arg4[%c0_6, %c0_7] : memref<1x256xf32, #tpu.memory_space<vmem>>, vector<1x256xf32>
    %8 = arith.addf %6, %7 : vector<1x256xf32>
    %cst_8 = arith.constant 0.000000e+00 : f32
    %9 = vector.broadcast %cst_8 : f32 to vector<1x256xf32>
    %10 = arith.minimumf %8, %9 : vector<1x256xf32>
    %11 = math.exp %10 : vector<1x256xf32>
    %c0_9 = arith.constant 0 : index
    %c0_10 = arith.constant 0 : index
    %12 = vector.load %arg5[%c0_9, %c0_10] : memref<256x64xf32, #tpu.memory_space<vmem>>, vector<256x64xf32>
    %cst_11 = arith.constant dense<0.000000e+00> : vector<1x64xf32>
    %13 = tpu.matmul %11, %12, %cst_11 {dimension_numbers = #tpu.dot_dimension_numbers<[1], [0], [0], [1], [0, 0, 1, 1], [], []>} : vector<1x256xf32>, vector<256x64xf32>, vector<1x64xf32> -> vector<1x64xf32>
    %c0_12 = arith.constant 0 : index
    %c0_13 = arith.constant 0 : index
    %14 = vector.load %arg6[%c0_12, %c0_13] : memref<1x64xf32, #tpu.memory_space<vmem>>, vector<1x64xf32>
    %15 = arith.addf %13, %14 : vector<1x64xf32>
    %c0_14 = arith.constant 0 : index
    %c0_15 = arith.constant 0 : index
    %16 = vector.load %arg7[%c0_14, %c0_15] : memref<1x64xf32, #tpu.memory_space<vmem>>, vector<1x64xf32>
    tpu.vector_store %arg7[%c0_14, %c0_15], %15 {strides = array<i32>} : memref<1x64xf32, #tpu.memory_space<vmem>>, vector<1x64xf32>,
    return
  }
  func.func @transform_0(%arg0: i32) -> (i32, i32) {
    %c0_i32 = arith.constant 0 : i32
    %c0_i32_0 = arith.constant 0 : i32
    return %arg0, %c0_i32 : i32, i32
  }
  func.func @transform_1(%arg0: i32) -> (i32, i32) {
    %c0_i32 = arith.constant 0 : i32
    %c0_i32_0 = arith.constant 0 : i32
    %c0_i32_1 = arith.constant 0 : i32
    return %c0_i32, %c0_i32_0 : i32, i32
  }
  func.func @transform_2(%arg0: i32) -> (i32, i32) {
    %c0_i32 = arith.constant 0 : i32
    %c0_i32_0 = arith.constant 0 : i32
    %c0_i32_1 = arith.constant 0 : i32
    return %c0_i32, %c0_i32_0 : i32, i32
  }
  func.func @transform_3(%arg0: i32) -> (i32, i32) {
    %c0_i32 = arith.constant 0 : i32
    %c0_i32_0 = arith.constant 0 : i32
    %c0_i32_1 = arith.constant 0 : i32
    return %c0_i32, %c0_i32_0 : i32, i32
  }
  func.func @transform_4(%arg0: i32) -> (i32, i32) {
    %c0_i32 = arith.constant 0 : i32
    %c0_i32_0 = arith.constant 0 : i32
    %c0_i32_1 = arith.constant 0 : i32
    return %c0_i32, %c0_i32_0 : i32, i32
  }
  func.func @transform_5(%arg0: i32) -> (i32, i32) {
    %c0_i32 = arith.constant 0 : i32
    %c0_i32_0 = arith.constant 0 : i32
    %c0_i32_1 = arith.constant 0 : i32
    return %c0_i32, %c0_i32_0 : i32, i32
  }
  func.func @transform_6(%arg0: i32) -> (i32, i32) {
    %c0_i32 = arith.constant 0 : i32
    %c0_i32_0 = arith.constant 0 : i32
    return %arg0, %c0_i32 : i32, i32
  }
}

</mosaic_0001>

<bundles_post_ra>
// kernel: tpu_custom_call.1
= control target key start
LH: loop header
LB: loop body
LE: loop exit
PB: predicated region body
PF: predicated region fallthrough
CT: control target
= control target key end

     0   :  { %11 = vsyncpa [#allocation3], 0  ;;  %s848_s0 = inlined_call_operand.vmem [shape: f32[1,128], index: 0, kind: input, shape index: {}]   ;;  %s849_s1 = inlined_call_operand.vmem [shape: f32[128,256], index: 1, kind: input, shape index: {}]   ;;  %s850_s2 = inlined_call_operand.hbm [shape: f32[128,256], index: 2, kind: input, shape index: {}]   ;;  %s851_s3 = inlined_call_operand.vmem [shape: f32[1,256], index: 3, kind: input, shape index: {}]   ;;  %s852_s4 = inlined_call_operand.vmem [shape: f32[256,64], index: 4, kind: input, shape index: {}]   ;;  %s853_s5 = inlined_call_operand.vmem [shape: f32[1,64], index: 5, kind: input, shape index: {}]   ;;  %s854_s6 = inlined_call_operand.hbm [shape: f32[1,64], index: 6, kind: output, shape index: {}]  }
   0x1   :  { %12 = vsyncpa [#allocation4], 0  ;;  %s576_s21 = smov [#allocation2]   ;;  %s528_s25 = scalar_lea.hbm %s850_s2, 4096 }
   0x2   :  { %s22_s22 = sshll.u32 %s576_s21, 4  ;;  %p529_p0 = scmp.ne.s32.totalorder %s850_s2, %s528_s25  ;;  %s23_s22 = int_to_ptr.vmem [resolvable:$true] %s22_s22 }
   0x3   :  { %p532_p1 = scmp.lt.u32.totalorder %s528_s25, %s850_s2 }
   0x5   :  { %p534_p2 = pnand %p532_p1, %p529_p0 }
   0x7   :  { %537 = shalt.err (!%p534_p2)
}
   0x8   :  { %s538_s30 = scalar_lea.vmem %s23_s22, 4096  ;;  %p543_p4 = scmp.lt.s32.totalorder %s23_s22, %s23_s22 }
   0x9   :  { %p539_p3 = scmp.ne.s32.totalorder %s23_s22, %s538_s30  ;;  %p544_p5 = scmp.lt.s32.totalorder %s538_s30, %s538_s30 }
   0xb   :  { %p545_p6 = por %p544_p5, %p543_p4 }
   0xd   :  { %p546_p7 = pnand %p545_p6, %p539_p3 }
   0xf   :  { %549 = shalt.err (!%p546_p7)
}
  0x10   :  { %s577_s7 = smov 256   ;;  %s578_s8 = smov 16  }
  0x11   :  { %28 = dma.hbm_to_vmem [thread:$0]  %s850_s2, 4096, %s23_s22, [#allocation3], %s577_s7, %s577_s7, %s578_s8  }
  0x12   :  { %572 = dma.done.wait [#allocation3], 4096  }
  0x13   :  { %573 = vsyncadd [#allocation3], 4294963200  ;;  %v579_v0 = vmov 0.0   ;;  %v73_v1 = vld [vmem:[#allocation2 + $0x8] sm:$0xff]  ;;  %v75_v2 = vld [vmem:[#allocation2 + $0x18] sm:$0xff]  ;;  %s580_s11 = smov [#allocation5]  }
  0x14   :  { %168 = vmatprep.mubr.f32.mxu0 %v579_v0  ;;  %v72_v3 = vld [vmem:[#allocation2] sm:$0xff]  ;;  %v421_v4 = vpack.c.bf16 %v75_v2, %v73_v1  ;;  %v74_v5 = vld [vmem:[#allocation2 + $0x10] sm:$0xff]  ;;  %v77_v6 = vld [vmem:[#allocation2 + $0x28] sm:$0xff]  ;;  %s377_s12 = sshll.u32 %s580_s11, 4  ;;  %vm369_vm0 = vcmask 516096   ;;  %s378_s12 = int_to_ptr.vmem [resolvable:$true] %s377_s12 }
  0x15   :  { %v79_v7 = vld [vmem:[#allocation2 + $0x38] sm:$0xff]  ;;  %v423_v8 = vpack.c.bf16 %v74_v5, %v72_v3  ;;  %v76_v10 = vld [vmem:[#allocation2 + $0x20] sm:$0xff]  ;;  %v78_v11 = vld [vmem:[#allocation2 + $0x30] sm:$0xff]  ;;  %s550_s13 = scalar_lea.vmem %s378_s12, 16  ;;  %s554_s14 = scalar_lea.vmem %s378_s12, 32 }
  0x16   :  { %v425_v9 = vpack.c.bf16 %v79_v7, %v77_v6  ;;  %v81_v12 = vld [vmem:[#allocation2 + $0x48] sm:$0xff]  ;;  %422 = vmatprep.subr.bf16.mxu0 %v421_v4  ;;  %v83_v13 = vld [vmem:[#allocation2 + $0x58] sm:$0xff]  ;;  %v427_v14 = vpack.c.bf16 %v78_v11, %v76_v10  ;;  %v80_v16 = vld [vmem:[#allocation2 + $0x40] sm:$0xff]  ;;  %p551_p8 = scmp.ne.s32.totalorder %s378_s12, %s550_s13  ;;  %p555_p9 = scmp.lt.s32.totalorder %s378_s12, %s378_s12 }
  0x17   :  { %424 = vmatpush1.bf16.msra.mxu0 %v423_v8  ;;  %v429_v15 = vpack.c.bf16 %v83_v13, %v81_v12  ;;  %v82_v17 = vld [vmem:[#allocation2 + $0x50] sm:$0xff]  ;;  %v85_v18 = vld [vmem:[#allocation2 + $0x68] sm:$0xff]  ;;  %v87_v19 = vld [vmem:[#allocation2 + $0x78] sm:$0xff]  ;;  %p556_p10 = scmp.lt.s32.totalorder %s554_s14, %s550_s13 }
  0x18   :  { %426 = vmatprep.subr.bf16.mxu0 %v425_v9  ;;  %v431_v20 = vpack.c.bf16 %v82_v17, %v80_v16  ;;  %v433_v21 = vpack.c.bf16 %v87_v19, %v85_v18  ;;  %v84_v22 = vld [vmem:[#allocation2 + $0x60] sm:$0xff]  ;;  %v86_v23 = vld [vmem:[#allocation2 + $0x70] sm:$0xff]  ;;  %v89_v24 = vld [vmem:[#allocation2 + $0x88] sm:$0xff] }
  0x19   :  { %v91_v25 = vld [vmem:[#allocation2 + $0x98] sm:$0xff]  ;;  %v435_v26 = vpack.c.bf16 %v86_v23, %v84_v22  ;;  %v88_v28 = vld [vmem:[#allocation2 + $0x80] sm:$0xff]  ;;  %v90_v29 = vld [vmem:[#allocation2 + $0x90] sm:$0xff]  ;;  %p557_p11 = por %p556_p10, %p555_p9 }
  0x1a   :  { %v437_v27 = vpack.c.bf16 %v91_v25, %v89_v24  ;;  %v93_v30 = vld [vmem:[#allocation2 + $0xa8] sm:$0xff]  ;;  %v95_v31 = vld [vmem:[#allocation2 + $0xb8] sm:$0xff]  ;;  %v439_v32 = vpack.c.bf16 %v90_v29, %v88_v28  ;;  %v92_v34 = vld [vmem:[#allocation2 + $0xa0] sm:$0xff] }
  0x1b   :  { %428 = vmatpush1.bf16.msra.mxu0 %v427_v14  ;;  %v441_v33 = vpack.c.bf16 %v95_v31, %v93_v30  ;;  %v94_v35 = vld [vmem:[#allocation2 + $0xb0] sm:$0xff]  ;;  %v97_v36 = vld [vmem:[#allocation2 + $0xc8] sm:$0xff]  ;;  %v99_v37 = vld [vmem:[#allocation2 + $0xd8] sm:$0xff]  ;;  %p558_p12 = pnand %p557_p11, %p551_p8 }
  0x1c   :  { %430 = vmatprep.subr.bf16.mxu0 %v429_v15  ;;  %v443_v38 = vpack.c.bf16 %v94_v35, %v92_v34  ;;  %v96_v39 = vld [vmem:[#allocation2 + $0xc0] sm:$0xff]  ;;  %v98_v40 = vld [vmem:[#allocation2 + $0xd0] sm:$0xff]  ;;  %v445_v41 = vpack.c.bf16 %v99_v37, %v97_v36  ;;  %v101_v42 = vld [vmem:[#allocation2 + $0xe8] sm:$0xff] }
  0x1d   :  { %v103_v43 = vld [vmem:[#allocation2 + $0xf8] sm:$0xff]  ;;  %v282_v44 = vld [vmem:[%s852_s4 + $0x80] sm:$0xff]  ;;  %v283_v45 = vld [vmem:[%s852_s4 + $0x88] sm:$0xff]  ;;  %v447_v53 = vpack.c.bf16 %v98_v40, %v96_v39 }
  0x1e   :  { %v266_v46 = vld [vmem:[%s852_s4] sm:$0xff]  ;;  %v267_v47 = vld [vmem:[%s852_s4 + $0x8] sm:$0xff]  ;;  %v485_v48 = vpack.c.bf16 %v283_v45, %v282_v44  ;;  %v284_v50 = vld [vmem:[%s852_s4 + $0x90] sm:$0xff]  ;;  %v449_v58 = vpack.c.bf16 %v103_v43, %v101_v42 }
  0x1f   :  { %432 = vmatpush1.bf16.msra.mxu0 %v431_v20  ;;  %v487_v49 = vpack.c.bf16 %v267_v47, %v266_v46  ;;  %v285_v51 = vld [vmem:[%s852_s4 + $0x98] sm:$0xff]  ;;  %v268_v52 = vld [vmem:[%s852_s4 + $0x10] sm:$0xff]  ;;  %v286_v56 = vld [vmem:[%s852_s4 + $0xa0] sm:$0xff] }
  0x20   :  { %434 = vmatprep.subr.bf16.mxu0 %v433_v21  ;;  %v489_v54 = vpack.c.bf16 %v285_v51, %v284_v50  ;;  %v269_v55 = vld [vmem:[%s852_s4 + $0x18] sm:$0xff]  ;;  %v287_v57 = vld [vmem:[%s852_s4 + $0xa8] sm:$0xff]  ;;  %v100_v59 = vld [vmem:[#allocation2 + $0xe0] sm:$0xff]  ;;  %486 = vmatprep.subr.bf16.mxu1 %v485_v48 }
  0x21   :  { %v102_v60 = vld [vmem:[#allocation2 + $0xf0] sm:$0xff]  ;;  %v40_v61 = vld [vmem:[%s849_s1 + $0x8] sm:$0xff]  ;;  %v42_v62 = vld [vmem:[%s849_s1 + $0x18] sm:$0xff]  ;;  %488 = vmatpush3.bf16.msra.mxu1 %v487_v49  ;;  %v491_v63 = vpack.c.bf16 %v269_v55, %v268_v52  ;;  %v493_v1 = vpack.c.bf16 %v287_v57, %v286_v56 }
  0x22   :  { %490 = vmatprep.subr.bf16.mxu1 %v489_v54  ;;  %v270_v2 = vld [vmem:[%s852_s4 + $0x20] sm:$0xff]  ;;  %v271_v3 = vld [vmem:[%s852_s4 + $0x28] sm:$0xff]  ;;  %v451_v4 = vpack.c.bf16 %v102_v60, %v100_v59  ;;  %v453_v6 = vpack.c.bf16 %v42_v62, %v40_v61  ;;  %v41_v8 = vld [vmem:[%s849_s1 + $0x10] sm:$0xff] }
  0x23   :  { %436 = vmatpush1.bf16.msra.mxu0 %v435_v26  ;;  %v674_v5 = vld [vmem:[%s848_s0] sm:$0x1]  ;;  %v44_v9 = vld [vmem:[%s849_s1 + $0x28] sm:$0xff]  ;;  %v46_v10 = vld [vmem:[%s849_s1 + $0x38] sm:$0xff]  ;;  %v495_v11 = vpack.c.bf16 %v271_v3, %v270_v2 }
  0x24   :  { %438 = vmatprep.subr.bf16.mxu0 %v437_v27  ;;  %v39_v7 = vld [vmem:[%s849_s1] sm:$0xff]  ;;  %v71_v12 = vmul.f32 %v674_v5, %v674_v5  ;;  %v457_v14 = vpack.c.bf16 %v46_v10, %v44_v9  ;;  %v45_v16 = vld [vmem:[%s849_s1 + $0x30] sm:$0xff]  ;;  %v48_v17 = vld [vmem:[%s849_s1 + $0x48] sm:$0xff] }
  0x25   :  { %492 = vmatpush3.bf16.msra.mxu1 %v491_v63  ;;  %v455_v13 = vpack.c.bf16 %v41_v8, %v39_v7  ;;  %v43_v15 = vld [vmem:[%s849_s1 + $0x20] sm:$0xff]  ;;  %v50_v18 = vld [vmem:[%s849_s1 + $0x58] sm:$0xff]  ;;  %v49_v22 = vld [vmem:[%s849_s1 + $0x50] sm:$0xff] }
  0x26   :  { %494 = vmatprep.subr.bf16.mxu1 %v493_v1  ;;  %v459_v19 = vpack.c.bf16 %v45_v16, %v43_v15  ;;  %v461_v20 = vpack.c.bf16 %v50_v18, %v48_v17  ;;  %v47_v21 = vld [vmem:[%s849_s1 + $0x40] sm:$0xff]  ;;  %v52_v23 = vld [vmem:[%s849_s1 + $0x68] sm:$0xff]  ;;  %v54_v24 = vld [vmem:[%s849_s1 + $0x78] sm:$0xff] }
  0x27   :  { %440 = vmatpush1.bf16.msra.mxu0 %v439_v32  ;;  %v465_v25 = vpack.c.bf16 %v54_v24, %v52_v23  ;;  %v51_v26 = vld [vmem:[%s849_s1 + $0x60] sm:$0xff]  ;;  %v53_v27 = vld [vmem:[%s849_s1 + $0x70] sm:$0xff]  ;;  %v56_v28 = vld [vmem:[%s849_s1 + $0x88] sm:$0xff] }
  0x28   :  { %442 = vmatprep.subr.bf16.mxu0 %v441_v33  ;;  %v58_v29 = vld [vmem:[%s849_s1 + $0x98] sm:$0xff]  ;;  %v467_v30 = vpack.c.bf16 %v53_v27, %v51_v26  ;;  %v55_v32 = vld [vmem:[%s849_s1 + $0x80] sm:$0xff]  ;;  %v57_v33 = vld [vmem:[%s849_s1 + $0x90] sm:$0xff] }
  0x29   :  { %496 = vmatpush3.bf16.msra.mxu1 %v495_v11  ;;  %v469_v31 = vpack.c.bf16 %v58_v29, %v56_v28  ;;  %v60_v34 = vld [vmem:[%s849_s1 + $0xa8] sm:$0xff]  ;;  %v62_v35 = vld [vmem:[%s849_s1 + $0xb8] sm:$0xff]  ;;  %v471_v36 = vpack.c.bf16 %v57_v33, %v55_v32  ;;  %v61_v39 = vld [vmem:[%s849_s1 + $0xb0] sm:$0xff] }
  0x2a   :  { %v473_v37 = vpack.c.bf16 %v62_v35, %v60_v34  ;;  %v64_v40 = vld [vmem:[%s849_s1 + $0xc8] sm:$0xff]  ;;  %v63_v44 = vld [vmem:[%s849_s1 + $0xc0] sm:$0xff]  ;;  %v65_v45 = vld [vmem:[%s849_s1 + $0xd0] sm:$0xff] }
  0x2b   :  { %444 = vmatpush1.bf16.msra.mxu0 %v443_v38  ;;  %v59_v38 = vld [vmem:[%s849_s1 + $0xa0] sm:$0xff]  ;;  %v68_v46 = vld [vmem:[%s849_s1 + $0xe8] sm:$0xff]  ;;  %v70_v47 = vld [vmem:[%s849_s1 + $0xf8] sm:$0xff]  ;;  %v479_v48 = vpack.c.bf16 %v65_v45, %v63_v44 }
  0x2c   :  { %446 = vmatprep.subr.bf16.mxu0 %v445_v41  ;;  %v66_v41 = vld [vmem:[%s849_s1 + $0xd8] sm:$0xff]  ;;  %v475_v42 = vpack.c.bf16 %v61_v39, %v59_v38  ;;  %v481_v49 = vpack.c.bf16 %v70_v47, %v68_v46  ;;  %v67_v50 = vld [vmem:[%s849_s1 + $0xe0] sm:$0xff]  ;;  %v69_v51 = vld [vmem:[%s849_s1 + $0xf0] sm:$0xff] }
  0x2d   :  { %v477_v43 = vpack.c.bf16 %v66_v41, %v64_v40  ;;  %v483_v52 = vpack.c.bf16 %v69_v51, %v67_v50  ;;  %v289_v54 = vld [vmem:[%s852_s4 + $0xb8] sm:$0xff]  ;;  %v272_v56 = vld [vmem:[%s852_s4 + $0x30] sm:$0xff]  ;;  %v290_v59 = vld [vmem:[%s852_s4 + $0xc0] sm:$0xff] }
  0x2e   :  { %v273_v57 = vld [vmem:[%s852_s4 + $0x38] sm:$0xff]  ;;  %v291_v60 = vld [vmem:[%s852_s4 + $0xc8] sm:$0xff]  ;;  %v274_v62 = vld [vmem:[%s852_s4 + $0x40] sm:$0xff] }
  0x2f   :  { %448 = vmatpush1.bf16.msra.mxu0 %v447_v53  ;;  %v288_v53 = vld [vmem:[%s852_s4 + $0xb0] sm:$0xff]  ;;  %v501_v61 = vpack.c.bf16 %v291_v60, %v290_v59  ;;  %v275_v63 = vld [vmem:[%s852_s4 + $0x48] sm:$0xff]  ;;  %v293_v3 = vld [vmem:[%s852_s4 + $0xd8] sm:$0xff] }
  0x30   :  { %450 = vmatprep.subr.bf16.mxu0 %v449_v58  ;;  %v497_v55 = vpack.c.bf16 %v289_v54, %v288_v53  ;;  %v499_v58 = vpack.c.bf16 %v273_v57, %v272_v56  ;;  %v503_v1 = vpack.c.bf16 %v275_v63, %v274_v62  ;;  %v292_v2 = vld [vmem:[%s852_s4 + $0xd0] sm:$0xff]  ;;  %v294_v8 = vld [vmem:[%s852_s4 + $0xe0] sm:$0xff]  ;;  %v295_v9 = vld [vmem:[%s852_s4 + $0xe8] sm:$0xff] }
  0x31   :  { %v278_v10 = vld [vmem:[%s852_s4 + $0x60] sm:$0xff]  ;;  %v509_v11 = vpack.c.bf16 %v295_v9, %v294_v8  ;;  %v280_v17 = vld [vmem:[%s852_s4 + $0x70] sm:$0xff]  ;;  %v281_v18 = vld [vmem:[%s852_s4 + $0x78] sm:$0xff] }
  0x32   :  { %498 = vmatprep.subr.bf16.mxu1 %v497_v55  ;;  %v246_v23 = vld [vmem:[%s851_s3] sm:$0x3] }
  0x33   :  { %452 = vmatpush1.bf16.msra.mxu0 %v451_v4  ;;  %500 = vmatpush3.bf16.msra.mxu1 %v499_v58  ;;  %v505_v4 = vpack.c.bf16 %v293_v3, %v292_v2 }
  0x34   :  { %454 = vmatprep.subr.bf16.mxu0 %v453_v6  ;;  %502 = vmatprep.subr.bf16.mxu1 %v501_v61  ;;  %v277_v6 = vld [vmem:[%s852_s4 + $0x58] sm:$0xff] }
  0x36   :  { %169 = vmatmul.mubr.f32.vlgmr.msra.gmra.mrb[0].mxu0 %v71_v12  ;;  %v279_v12 = vld [vmem:[%s852_s4 + $0x68] sm:$0xff] }
  0x37   :  { %456 = vmatpush1.bf16.msra.mxu0 %v455_v13  ;;  %239 = vmatprep.mubr.f32.mxu0 %v579_v0  ;;  %v463_v0 = vpack.c.bf16 %v49_v22, %v47_v21  ;;  %v296_v13 = vld [vmem:[%s852_s4 + $0xf0] sm:$0xff]  ;;  %v511_v15 = vpack.c.bf16 %v279_v12, %v278_v10 }
  0x38   :  { %458 = vmatprep.subr.bf16.mxu0 %v457_v14  ;;  %504 = vmatpush3.bf16.msra.mxu1 %v503_v1  ;;  %v297_v14 = vld [vmem:[%s852_s4 + $0xf8] sm:$0xff] }
  0x39   :  { %506 = vmatprep.subr.bf16.mxu1 %v505_v4  ;;  %v513_v16 = vpack.c.bf16 %v297_v14, %v296_v13 }
  0x3b   :  { %460 = vmatpush1.bf16.msra.mxu0 %v459_v19  ;;  %v515_v19 = vpack.c.bf16 %v281_v18, %v280_v17 }
  0x3c   :  { %462 = vmatprep.subr.bf16.mxu0 %v461_v20  ;;  %v248_v20 = vlaneseq }
  0x3e   :  { %v249_v21 = vshrl.u32 %v248_v20, 7 }
  0x3f   :  { %464 = vmatpush1.bf16.msra.mxu0 %v463_v0 }
  0x40   :  { %466 = vmatprep.subr.bf16.mxu0 %v465_v25  ;;  %v250_v22 = vsub.s32 0, %v249_v21  ;;  %v254_v24 = vsub.s32 1, %v249_v21 }
  0x42   :  { %v251_v0 = vrot.slane %v246_v23, %v250_v22  ;;  %v255_v25 = vrot.slane %v246_v23, %v254_v24 }
  0x43   :  { %468 = vmatpush1.bf16.msra.mxu0 %v467_v30 }
  0x44   :  { %470 = vmatprep.subr.bf16.mxu0 %v469_v31 }
  0x47   :  { %472 = vmatpush1.bf16.msra.mxu0 %v471_v36 }
  0x48   :  { %474 = vmatprep.subr.bf16.mxu0 %v473_v37  ;;  %v298_v37 = vld [vmem:[%s853_s5] sm:$0x1] }
  0x4b   :  { %476 = vmatpush1.bf16.msra.mxu0 %v475_v42 }
  0x4c   :  { %478 = vmatprep.subr.bf16.mxu0 %v477_v43 }
  0x4f   :  { %480 = vmatpush1.bf16.msra.mxu0 %v479_v48 }
  0x50   :  { %482 = vmatprep.subr.bf16.mxu0 %v481_v49 }
  0x53   :  { %484 = vmatpush1.bf16.msra.mxu0 %v483_v52 }
  0x56   :  { %240 = vmatmul.mubr.f32.vlgmr.msra.gmra.mrb[0].mxu0 %v674_v5  ;;  %v276_v5 = vld [vmem:[%s852_s4 + $0x50] sm:$0xff] }
  0x57   :  { %v507_v7 = vpack.c.bf16 %v277_v6, %v276_v5 }
  0x59   :  { %508 = vmatpush3.bf16.msra.mxu1 %v507_v7 }
  0x5a   :  { %510 = vmatprep.subr.bf16.mxu1 %v509_v11 }
  0x5d   :  { %512 = vmatpush3.bf16.msra.mxu1 %v511_v15 }
  0x5e   :  { %514 = vmatprep.subr.bf16.mxu1 %v513_v16 }
  0x61   :  { %516 = vmatpush3.bf16.msra.mxu1 %v515_v19 }
 0x129   :  { %v241_v26 = vpop.f32.mrb[0].mxu0 }
 0x12a   :  { %v258_v27 = vadd.f32 %v251_v0, %v241_v26  ;;  %v243_v28 = vpop.f32.mrb[1].mxu0 }
 0x12b   :  { %v259_v29 = vadd.f32 %v255_v25, %v243_v28 }
 0x12c   :  { %v260_v30 = vmin.f32 %v258_v27, 0.0 }
 0x12d   :  { %v261_v31 = vmin.f32 %v259_v29, 0.0 }
 0x12e   :  { %v262_v32 = vmul.f32 1.442695, %v260_v30 }
 0x12f   :  { %v264_v33 = vmul.f32 1.442695, %v261_v31 }
 0x131   :  { %524 = vpow2.f32 %v264_v33 }
 0x132   :  { %526 = vpow2.f32 %v262_v32 }
 0x13b   :  { %v525_v34 = vpop.eup %524 }
 0x13c   :  { %v527_v35 = vpop.eup %526  ;;  %363 = vmatprep.mubr.f32.mxu1 %v525_v34 }
 0x13d   :  { %364 = vmatmul.mubr.f32.vlgmr.msra.gmra.mrb[0].mxu1 %v527_v35 }
 0x210   :  { %v418_v36 = vpop.f32.mrb[0].mxu1 }
 0x211   :  { %v419_v38 = vpop.f32.mrb[1].mxu1 }
 0x212   :  { %v420_v39 = vadd.f32 %v419_v38, %v418_v36 }
 0x214   :  { %v366_v40 = vadd.f32 %v420_v39, %v298_v37 }
 0x216   :  { %370 = vst.msk [vmem:[#allocation5] sm:$0x1] %vm369_vm0, %v366_v40 }
 0x217   :  { %561 = shalt.err (!%p558_p12)
}
 0x218   :  { %s562_s5 = scalar_lea.hbm %s854_s6, 16 }
 0x219   :  { %p563_p13 = scmp.ne.s32.totalorder %s854_s6, %s562_s5  ;;  %p566_p0 = scmp.lt.u32.totalorder %s562_s5, %s854_s6 }
 0x21b   :  { %p568_p1 = pnand %p566_p0, %p563_p13 }
 0x21d   :  { %571 = shalt.err (!%p568_p1)
}
 0x21e   :  { %380 = dma.vmem_to_hbm [thread:$0]  %s378_s12, 16, %s854_s6, [#allocation4]  }
 0x21f   :  { %574 = dma.done.wait [#allocation4], 16  }
 0x220   :  { %575 = vsyncadd [#allocation4], 4294967280 }
 0x221   :  { %384 = vsyncpa [#allocation3], 1 }
 0x222   :  { %385 = vsyncpa [#allocation4], 1 }

</bundles_post_ra>
